<compile_context>
chip_gen: v6e
topology: v6e:2x2x1
jax: 0.10.0
libtpu: 0.0.40
codegen_flags: <defaults>
</compile_context>

<pallas_src>
import jax
import jax.numpy as jnp
from jax import lax
from jax.experimental import pallas as pl
from jax.experimental.pallas import tpu as pltpu

_SUBLANE = 8
_LANE = 128


def _round_up(x, m):
    return ((x + m - 1) // m) * m


def _lane_padded_bytes(rows, cols, itemsize):
    """Real VMEM footprint of a (rows, cols) array stored in (8,128) tiles."""
    return _round_up(max(int(rows), 1), _SUBLANE) * _round_up(max(int(cols), 1), _LANE) * itemsize


def _onehot_gather_kernel(idx_ref, table_ref, out_ref):
    """out[r, :] = table[idx[r], :] via a one-hot MXU matmul (block-dense store).

    Out-of-range ids select no row and yield a zero output row (nn.Embedding
    would raise); there is no possibility of an OOB memory access.
    """
    block_n = out_ref.shape[0]
    v_pad = table_ref.shape[0]

    idx = idx_ref[...]                                                # (block_n, 1) int32
    iota = lax.broadcasted_iota(jnp.int32, (block_n, v_pad), 1)       # lane iota
    one_hot = (idx == iota).astype(jnp.bfloat16)                      # exact 0/1

    t = table_ref[...]
    if table_ref.dtype == jnp.float32:
        # 3-way bf16 split of the f32 table -> three exact bf16 MXU matmuls,
        # recombined in f32: reproduces the exact gather (<= 1 ulp) without
        # relying on f32-matmul precision modes.
        t_hi = t.astype(jnp.bfloat16)
        r1 = t - t_hi.astype(jnp.float32)
        t_mid = r1.astype(jnp.bfloat16)
        t_lo = (r1 - t_mid.astype(jnp.float32)).astype(jnp.bfloat16)
        acc = jnp.dot(one_hot, t_hi, preferred_element_type=jnp.float32)
        acc = acc + jnp.dot(one_hot, t_mid, preferred_element_type=jnp.float32)
        acc = acc + jnp.dot(one_hot, t_lo, preferred_element_type=jnp.float32)
    else:
        acc = jnp.dot(one_hot.astype(t.dtype), t, preferred_element_type=jnp.float32)

    out_ref[...] = acc.astype(out_ref.dtype)


def embedding_lookup(n_id, table, *, onehot_max_vocab=2048,
                     residency_budget_bytes=16 << 20):
    """x = table[n_id]  (equivalent to nn.Embedding forward)."""
    n = int(n_id.shape[0])
    v, d = int(table.shape[0]), int(table.shape[1])
    itemsize = jnp.dtype(table.dtype).itemsize

    if n == 0:
        return jnp.zeros((0, d), table.dtype)

    # Residency / one-hot gate with (8,128)-tile-padded accounting: the table
    # BlockSpec input is double-buffered in VMEM.
    table_vmem_bytes = 2 * _lane_padded_bytes(v, d, itemsize)
    if v > onehot_max_vocab or table_vmem_bytes > residency_budget_bytes:
        # TODO(synk): streaming per-block DMA row gather (manual double-buffered
        # pltpu.make_async_copy of needed rows from HBM) for vocabularies too
        # large for the resident-table/one-hot path; XLA gather fallback for now.
        return jnp.take(table, jnp.clip(n_id, 0, v - 1).astype(jnp.int32), axis=0)

    # Pad the vocab axis to a sublane multiple with zero rows (never selected).
    v_pad = _round_up(v, _SUBLANE)
    if v_pad != v:
        table = jnp.concatenate(
            [table, jnp.zeros((v_pad - v, d), table.dtype)], axis=0)

    # Block size tied to d: target >= ~512 KiB of output per grid step
    # (amortizes the ~0.35 us per-step overhead), capped so the in-kernel
    # one-hot (block_n, v_pad) bf16 intermediate stays ~<= 4 MiB. Small N
    # collapses to a single grid step.
    v_lanes = _round_up(v_pad, _LANE)
    rows_for_output = (512 << 10) // max(1, d * itemsize)
    rows_for_onehot = (4 << 20) // (v_lanes * 2)
    block_cap = max(_SUBLANE, min(8192, rows_for_output, rows_for_onehot))
    block_cap = (block_cap // _SUBLANE) * _SUBLANE
    block_n = min(_round_up(n, _SUBLANE), block_cap)
    padded_n = _round_up(n, block_n)

    # Per-block index input (VMEM column vector); padded tail rows select row 0
    # and are sliced off below.
    idx = jnp.zeros((padded_n, 1), jnp.int32).at[:n, 0].set(n_id.astype(jnp.int32))

    # VMEM budget with (8,128) tile padding (narrow d would otherwise be
    # under-counted ~4x): resident table (x2 buffers) + idx/out blocks (x2)
    # + one-hot intermediate + split temporaries + slack.
    vmem_bytes = (
        table_vmem_bytes
        + 2 * _lane_padded_bytes(block_n, 1, 4)
        + 2 * _lane_padded_bytes(block_n, d, itemsize)
        + _round_up(block_n, _SUBLANE) * v_lanes * 2
        + 4 * _lane_padded_bytes(v_pad, d, 4)
    )
    vmem_limit = int(min(max(vmem_bytes + (4 << 20), 16 << 20), 40 << 20))

    # TODO(synk): for latency-critical small-N lookups, hide the first table
    # HBM->VMEM DMA behind preceding XLA ops via a cross-call prefetch
    # (semaphore-output future) instead of the in-call pipeline prologue.
    out = pl.pallas_call(
        _onehot_gather_kernel,
        out_shape=jax.ShapeDtypeStruct((padded_n, d), table.dtype),
        grid=(padded_n // block_n,),
        in_specs=[
            pl.BlockSpec((block_n, 1), lambda i: (i, 0)),   # per-block indices
            pl.BlockSpec((v_pad, d), lambda i: (0, 0)),     # resident table (constant block)
        ],
        out_specs=pl.BlockSpec((block_n, d), lambda i: (i, 0)),
        compiler_params=pltpu.CompilerParams(
            # No cross-step scratch dependency, so the row axis is safely
            # "parallel": on v7x it shards across both TensorCores and each
            # core DMAs its own resident table copy.
            dimension_semantics=("parallel",),
            vmem_limit_bytes=vmem_limit,
        ),
    )(idx, table)
    return out[:n]


class TypeDictNodeEncoder:
    """JAX/Pallas port of GTBenchmark Hetero_Embed TypeDictNodeEncoder.

    Builds an embedding table for every node type that has NO 'x' feature
    (mirrors the hasattr(self.data[node_type], 'x') check). All per-type
    tables are fused into one flat table with per-type row offsets so that a
    single pallas_call serves every encoded node type in a batch.
    """

    def __init__(self, dim_emb, node_type_num_nodes, key):
        self.dim_emb = dim_emb
        self.node_types = sorted(node_type_num_nodes)
        self.offsets = {}
        self.num_nodes = {}
        tables = []
        off = 0
        for i, nt in enumerate(self.node_types):
            num_nodes = int(node_type_num_nodes[nt])
            k = jax.random.fold_in(key, i)
            # nn.Embedding default init: weight ~ N(0, 1)
            tables.append(jax.random.normal(k, (num_nodes, dim_emb), jnp.float32))
            self.offsets[nt] = off
            self.num_nodes[nt] = num_nodes
            off += num_nodes
        if tables:
            self.flat_table = jnp.concatenate(tables, axis=0)
        else:
            self.flat_table = jnp.zeros((0, dim_emb), jnp.float32)
        # Per-type views (same storage/values) for reference checks.
        self.tables = {
            nt: self.flat_table[self.offsets[nt]:self.offsets[nt] + self.num_nodes[nt]]
            for nt in self.node_types
        }

    def __call__(self, batch):
        out = {nt: dict(feats) for nt, feats in batch.items()}
        enc_types = [nt for nt in batch if nt in self.offsets]
        if not enc_types:
            return out
        # Fuse all encoded types into ONE lookup against the flat table
        # (per-type row offsets), amortizing launch + table-DMA cost.
        sizes = [int(batch[nt]["n_id"].shape[0]) for nt in enc_types]
        flat_idx = jnp.concatenate(
            [batch[nt]["n_id"].astype(jnp.int32) + self.offsets[nt] for nt in enc_types]
        )
        flat_x = embedding_lookup(flat_idx, self.flat_table)
        start = 0
        for nt, sz in zip(enc_types, sizes):
            out[nt]["x"] = flat_x[start:start + sz]
            start += sz
        return out


if __name__ == "__main__":
    key = jax.random.PRNGKey(0)
    dim_emb = 32
    # node types WITHOUT an 'x' attribute -> get an embedding table
    node_type_num_nodes = {"author": 64, "paper": 96}
    enc = TypeDictNodeEncoder(dim_emb, node_type_num_nodes, key)

    k1, k2 = jax.random.split(jax.random.fold_in(key, 100))
    batch = {
        "author": {"n_id": jax.random.randint(k1, (16,), 0, 64, dtype=jnp.int32)},
        "paper":  {"n_id": jax.random.randint(k2, (16,), 0, 96, dtype=jnp.int32)},
        # this type already has features 'x' -> no encoder built for it
        "field":  {"n_id": jnp.arange(16, dtype=jnp.int32),
                   "x": jnp.ones((16, dim_emb), jnp.float32)},
    }

    out = enc(batch)

    for nt in ("author", "paper"):
        x = jax.block_until_ready(out[nt]["x"])
        ref = jnp.take(enc.tables[nt], batch[nt]["n_id"], axis=0)
        assert x.shape == (16, dim_emb) and x.dtype == jnp.float32
        assert jnp.allclose(x, ref, rtol=1e-6, atol=1e-6), f"mismatch for node type {nt}"
    # untouched type is passed through unchanged
    assert jnp.array_equal(out["field"]["x"], batch["field"]["x"])

    print("KERNEL_OK")
</pallas_src>

<mosaic_0001>
module attributes {stable_mosaic.version = 11 : i64} {
  func.func @_onehot_gather_kernel(%arg0: i32, %arg1: memref<32x1xi32, #tpu.memory_space<vmem>>, %arg2: memref<160x32xf32, #tpu.memory_space<vmem>>, %arg3: memref<32x32xf32, #tpu.memory_space<vmem>>) attributes {dimension_semantics = [#tpu.dimension_semantics<parallel>], iteration_bounds = array<i64: 1>, scalar_prefetch = 0 : i64, scratch_operands = 0 : i64, tpu.core_type = #tpu.core_type<tc>, window_params = [{transform_indices = @transform_0, window_bounds = array<i64: 32, 1>}, {pipeline_mode = #tpu.pipeline_mode<synchronous>, transform_indices = @transform_1, window_bounds = array<i64: 160, 32>}, {transform_indices = @transform_2, window_bounds = array<i64: 32, 32>}]} {
    %c0 = arith.constant 0 : index
    %c0_0 = arith.constant 0 : index
    %0 = vector.load %arg1[%c0, %c0_0] : memref<32x1xi32, #tpu.memory_space<vmem>>, vector<32x1xi32>
    %1 = tpu.iota {dimensions = array<i32: 1>} : vector<32x160xi32>
    %2 = vector.broadcast %0 : vector<32x1xi32> to vector<32x160xi32>
    %3 = arith.cmpi eq, %2, %1 : vector<32x160xi32>
    %4 = arith.extui %3 : vector<32x160xi1> to vector<32x160xi32>
    %5 = arith.sitofp %4 : vector<32x160xi32> to vector<32x160xf32>
    %6 = arith.truncf %5 : vector<32x160xf32> to vector<32x160xbf16>
    %c0_1 = arith.constant 0 : index
    %c0_2 = arith.constant 0 : index
    %7 = vector.load %arg2[%c0_1, %c0_2] : memref<160x32xf32, #tpu.memory_space<vmem>>, vector<160x32xf32>
    %8 = arith.truncf %7 : vector<160x32xf32> to vector<160x32xbf16>
    %9 = arith.extf %8 : vector<160x32xbf16> to vector<160x32xf32>
    %10 = arith.subf %7, %9 : vector<160x32xf32>
    %11 = arith.truncf %10 : vector<160x32xf32> to vector<160x32xbf16>
    %12 = arith.extf %11 : vector<160x32xbf16> to vector<160x32xf32>
    %13 = arith.subf %10, %12 : vector<160x32xf32>
    %14 = arith.truncf %13 : vector<160x32xf32> to vector<160x32xbf16>
    %cst = arith.constant dense<0.000000e+00> : vector<32x32xf32>
    %15 = tpu.matmul %6, %8, %cst {dimension_numbers = #tpu.dot_dimension_numbers<[1], [0], [0], [1], [0, 0, 1, 1], [], []>} : vector<32x160xbf16>, vector<160x32xbf16>, vector<32x32xf32> -> vector<32x32xf32>
    %cst_3 = arith.constant dense<0.000000e+00> : vector<32x32xf32>
    %16 = tpu.matmul %6, %11, %cst_3 {dimension_numbers = #tpu.dot_dimension_numbers<[1], [0], [0], [1], [0, 0, 1, 1], [], []>} : vector<32x160xbf16>, vector<160x32xbf16>, vector<32x32xf32> -> vector<32x32xf32>
    %17 = arith.addf %15, %16 : vector<32x32xf32>
    %cst_4 = arith.constant dense<0.000000e+00> : vector<32x32xf32>
    %18 = tpu.matmul %6, %14, %cst_4 {dimension_numbers = #tpu.dot_dimension_numbers<[1], [0], [0], [1], [0, 0, 1, 1], [], []>} : vector<32x160xbf16>, vector<160x32xbf16>, vector<32x32xf32> -> vector<32x32xf32>
    %19 = arith.addf %17, %18 : vector<32x32xf32>
    %c0_5 = arith.constant 0 : index
    %c0_6 = arith.constant 0 : index
    %20 = vector.load %arg3[%c0_5, %c0_6] : memref<32x32xf32, #tpu.memory_space<vmem>>, vector<32x32xf32>
    tpu.vector_store %arg3[%c0_5, %c0_6], %19 {strides = array<i32>} : memref<32x32xf32, #tpu.memory_space<vmem>>, vector<32x32xf32>,
    return
  }
  func.func @transform_0(%arg0: i32) -> (i32, i32) {
    %c0_i32 = arith.constant 0 : i32
    %c0_i32_0 = arith.constant 0 : i32
    return %arg0, %c0_i32 : i32, i32
  }
  func.func @transform_1(%arg0: i32) -> (i32, i32) {
    %c0_i32 = arith.constant 0 : i32
    %c0_i32_0 = arith.constant 0 : i32
    %c0_i32_1 = arith.constant 0 : i32
    return %c0_i32, %c0_i32_0 : i32, i32
  }
  func.func @transform_2(%arg0: i32) -> (i32, i32) {
    %c0_i32 = arith.constant 0 : i32
    %c0_i32_0 = arith.constant 0 : i32
    return %arg0, %c0_i32 : i32, i32
  }
}

</mosaic_0001>

<bundles_post_ra>
// kernel: tpu_custom_call.1
= control target key start
LH: loop header
LB: loop body
LE: loop exit
PB: predicated region body
PF: predicated region fallthrough
CT: control target
= control target key end

     0   :  { %v444_v2 = vmov 0   ;;  %s687_s0 = inlined_call_operand.vmem [shape: s32[32,1], index: 0, kind: input, shape index: {}]   ;;  %s688_s1 = inlined_call_operand.vmem [shape: f32[160,32], index: 1, kind: input, shape index: {}]   ;;  %s689_s2 = inlined_call_operand.hbm [shape: f32[32,32], index: 2, kind: output, shape index: {}]  }
   0x1   :  { %v13_v0 = vld [vmem:[%s687_s0] sm:$0xff]  ;;  %v15_v1 = vld [vmem:[%s687_s0 + $0x10] sm:$0xff]  ;;  %420 = vset.pattern.permute.xlu0 %v444_v2  ;;  %v14_v3 = vld [vmem:[%s687_s0 + $0x8] sm:$0xff]  ;;  %421 = vset.pattern.permute.xlu1 %v444_v2 }
   0x2   :  { %v16_v4 = vld [vmem:[%s687_s0 + $0x18] sm:$0xff]  ;;  %v74_v5 = vld [vmem:[%s688_s1 + $0x70] sm:$0xff]  ;;  %21 = vperm.xlu0 %420, %v13_v0   ;;  %27 = vperm.xlu1 %421, %v15_v1   ;;  %v72_v8 = vld [vmem:[%s688_s1 + $0x60] sm:$0xff] }
   0x3   :  { %v75_v6 = vld [vmem:[%s688_s1 + $0x78] sm:$0xff]  ;;  %v73_v9 = vld [vmem:[%s688_s1 + $0x68] sm:$0xff]  ;;  %v70_v10 = vld [vmem:[%s688_s1 + $0x50] sm:$0xff]  ;;  %197 = vmatprep.subr.bf16.mxu0 %v444_v2  ;;  %246 = vmatprep.subr.bf16.mxu1 %v444_v2 }
   0x4   :  { %v87_v7 = vpack.c.bf16 %v75_v6, %v74_v5  ;;  %v86_v11 = vpack.c.bf16 %v73_v9, %v72_v8  ;;  %v71_v12 = vld [vmem:[%s688_s1 + $0x58] sm:$0xff]  ;;  %v68_v13 = vld [vmem:[%s688_s1 + $0x40] sm:$0xff]  ;;  %v69_v14 = vld [vmem:[%s688_s1 + $0x48] sm:$0xff] }
   0x5   :  { %v85_v17 = vpack.c.bf16 %v71_v12, %v70_v10  ;;  %v505_v18 = vpack.c.bf16 %v69_v14, %v68_v13  ;;  %v66_v19 = vld [vmem:[%s688_s1 + $0x30] sm:$0xff]  ;;  %v67_v20 = vld [vmem:[%s688_s1 + $0x38] sm:$0xff] }
   0x6   :  { %v104_v15 = vunpack.c.l.bf16 %v87_v7  ;;  %v105_v16 = vunpack.c.h.bf16 %v87_v7  ;;  %247 = vmatpush1.bf16.msra.mxu1 %v87_v7  ;;  %v102_v21 = vunpack.c.l.bf16 %v86_v11  ;;  %v103_v22 = vunpack.c.h.bf16 %v86_v11  ;;  %24 = vperm.xlu0 %420, %v14_v3  }
   0x7   :  { %248 = vmatprep.subr.bf16.mxu1 %v444_v2  ;;  %v514_v23 = vpack.c.bf16 %v67_v20, %v66_v19  ;;  %30 = vperm.xlu1 %421, %v16_v4   ;;  %v100_v26 = vunpack.c.l.bf16 %v85_v17  ;;  %v101_v27 = vunpack.c.h.bf16 %v85_v17  ;;  %v98_v30 = vunpack.c.l.bf16 %v505_v18 }
   0x8   :  { %v124_v24 = vsub.f32 %v74_v5, %v104_v15  ;;  %v125_v25 = vsub.f32 %v75_v6, %v105_v16  ;;  %v122_v28 = vsub.f32 %v72_v8, %v102_v21  ;;  %v123_v29 = vsub.f32 %v73_v9, %v103_v22 }
   0x9   :  { %v99_v31 = vunpack.c.h.bf16 %v505_v18  ;;  %v120_v33 = vsub.f32 %v70_v10, %v100_v26  ;;  %v121_v34 = vsub.f32 %v71_v12, %v101_v27  ;;  %v96_v35 = vunpack.c.l.bf16 %v514_v23 }
   0xa   :  { %v137_v32 = vpack.c.bf16 %v125_v25, %v124_v24  ;;  %249 = vmatpush1.bf16.msra.mxu1 %v86_v11 }
   0xb   :  { %7 = vsyncpa [#allocation3], 0  ;;  %v136_v36 = vpack.c.bf16 %v123_v29, %v122_v28  ;;  %250 = vmatprep.subr.bf16.mxu1 %v444_v2  ;;  %v118_v37 = vsub.f32 %v68_v13, %v98_v30  ;;  %v119_v38 = vsub.f32 %v69_v14, %v99_v31  ;;  %v97_v39 = vunpack.c.h.bf16 %v514_v23  ;;  %v64_v48 = vld [vmem:[%s688_s1 + $0x20] sm:$0xff]  ;;  %v65_v49 = vld [vmem:[%s688_s1 + $0x28] sm:$0xff] }
   0xc   :  { %v154_v40 = vunpack.c.l.bf16 %v137_v32  ;;  %v155_v41 = vunpack.c.h.bf16 %v137_v32  ;;  %198 = vmatpush1.bf16.msra.mxu0 %v137_v32  ;;  %v135_v42 = vpack.c.bf16 %v121_v34, %v120_v33  ;;  %v116_v43 = vsub.f32 %v66_v19, %v96_v35  ;;  %v62_v50 = vld [vmem:[%s688_s1 + $0x10] sm:$0xff]  ;;  %v63_v55 = vld [vmem:[%s688_s1 + $0x18] sm:$0xff]  ;;  %v60_v56 = vld [vmem:[%s688_s1] sm:$0xff] }
   0xd   :  { %199 = vmatprep.subr.bf16.mxu0 %v444_v2  ;;  %v152_v44 = vunpack.c.l.bf16 %v136_v36  ;;  %v153_v45 = vunpack.c.h.bf16 %v136_v36  ;;  %v134_v46 = vpack.c.bf16 %v119_v38, %v118_v37  ;;  %v117_v47 = vsub.f32 %v67_v20, %v97_v39  ;;  %v61_v57 = vld [vmem:[%s688_s1 + $0x8] sm:$0xff]  ;;  %v78_v15 = vld [vmem:[%s688_s1 + $0x90] sm:$0xff]  ;;  %v79_v16 = vld [vmem:[%s688_s1 + $0x98] sm:$0xff] }
   0xe   :  { %v174_v51 = vsub.f32 %v124_v24, %v154_v40  ;;  %v175_v52 = vsub.f32 %v125_v25, %v155_v41  ;;  %v150_v53 = vunpack.c.l.bf16 %v135_v42  ;;  %v151_v54 = vunpack.c.h.bf16 %v135_v42  ;;  %251 = vmatpush1.bf16.msra.mxu1 %v85_v17  ;;  %v76_v21 = vld [vmem:[%s688_s1 + $0x80] sm:$0xff]  ;;  %v77_v22 = vld [vmem:[%s688_s1 + $0x88] sm:$0xff]  ;;  %s447_s1 = smov [#allocation2]  }
   0xf   :  { %v540_v58 = vsub.f32 %v122_v28, %v152_v44  ;;  %v542_v59 = vsub.f32 %v123_v29, %v153_v45  ;;  %252 = vmatprep.subr.bf16.mxu1 %v444_v2  ;;  %v148_v60 = vunpack.c.l.bf16 %v134_v46  ;;  %v149_v61 = vunpack.c.h.bf16 %v134_v46  ;;  %s357_s27 = sshll.u32 %s447_s1, 4  ;;  %s358_s27 = int_to_ptr.vmem [resolvable:$true] %s357_s27 }
  0x10   :  { %200 = vmatpush1.bf16.msra.mxu0 %v136_v36  ;;  %v545_v62 = vsub.f32 %v120_v33, %v150_v53  ;;  %v547_v63 = vsub.f32 %v121_v34, %v151_v54  ;;  %v133_v0 = vpack.c.bf16 %v117_v47, %v116_v43  ;;  %v82_v1 = vpack.c.bf16 %v65_v49, %v64_v48  ;;  %s422_s28 = scalar_lea.vmem %s358_s27, 512  ;;  %p427_p1 = scmp.lt.s32.totalorder %s358_s27, %s358_s27 }
  0x11   :  { %201 = vmatprep.subr.bf16.mxu0 %v444_v2  ;;  %v550_v3 = vsub.f32 %v118_v37, %v148_v60  ;;  %v169_v4 = vsub.f32 %v119_v38, %v149_v61  ;;  %v552_v5 = vpack.c.bf16 %v63_v55, %v62_v50  ;;  %v554_v6 = vpack.c.bf16 %v61_v57, %v60_v56  ;;  %p423_p0 = scmp.ne.s32.totalorder %s358_s27, %s422_s28  ;;  %p428_p2 = scmp.lt.s32.totalorder %s422_s28, %s422_s28 }
  0x12   :  { %253 = vmatpush1.bf16.msra.mxu1 %v505_v18  ;;  %v146_v7 = vunpack.c.l.bf16 %v133_v0  ;;  %v147_v8 = vunpack.c.h.bf16 %v133_v0  ;;  %v94_v9 = vunpack.c.l.bf16 %v82_v1  ;;  %v95_v10 = vunpack.c.h.bf16 %v82_v1 }
  0x13   :  { %254 = vmatprep.subr.bf16.mxu1 %v444_v2  ;;  %v92_v11 = vunpack.c.l.bf16 %v552_v5  ;;  %v93_v12 = vunpack.c.h.bf16 %v552_v5  ;;  %v90_v13 = vunpack.c.l.bf16 %v554_v6  ;;  %v91_v14 = vunpack.c.h.bf16 %v554_v6  ;;  %p429_p3 = por %p428_p2, %p427_p1 }
  0x14   :  { %202 = vmatpush1.bf16.msra.mxu0 %v135_v42  ;;  %v166_v17 = vsub.f32 %v116_v43, %v146_v7  ;;  %v167_v18 = vsub.f32 %v117_v47, %v147_v8  ;;  %v114_v19 = vsub.f32 %v64_v48, %v94_v9  ;;  %v115_v20 = vsub.f32 %v65_v49, %v95_v10 }
  0x15   :  { %203 = vmatprep.subr.bf16.mxu0 %v444_v2  ;;  %v112_v24 = vsub.f32 %v62_v50, %v92_v11  ;;  %v113_v25 = vsub.f32 %v63_v55, %v93_v12  ;;  %v110_v26 = vsub.f32 %v60_v56, %v90_v13  ;;  %v111_v27 = vsub.f32 %v61_v57, %v91_v14  ;;  %p430_p4 = pnand %p429_p3, %p423_p0 }
  0x16   :  { %255 = vmatpush1.bf16.msra.mxu1 %v514_v23  ;;  %v132_v28 = vpack.c.bf16 %v115_v20, %v114_v19  ;;  %v89_v29 = vpack.c.bf16 %v79_v16, %v78_v15  ;;  %v88_v32 = vpack.c.bf16 %v77_v22, %v76_v21  ;;  %v577_v33 = vpack.c.bf16 %v175_v52, %v174_v51 }
  0x17   :  { %256 = vmatprep.subr.bf16.mxu1 %v444_v2  ;;  %v131_v30 = vpack.c.bf16 %v113_v25, %v112_v24  ;;  %v130_v31 = vpack.c.bf16 %v111_v27, %v110_v26  ;;  %v583_v52 = vpack.c.bf16 %v542_v59, %v540_v58  ;;  %v588_v53 = vpack.c.bf16 %v547_v63, %v545_v62 }
  0x18   :  { %204 = vmatpush1.bf16.msra.mxu0 %v134_v46  ;;  %v144_v34 = vunpack.c.l.bf16 %v132_v28  ;;  %v145_v35 = vunpack.c.h.bf16 %v132_v28  ;;  %v108_v36 = vunpack.c.l.bf16 %v89_v29  ;;  %v109_v37 = vunpack.c.h.bf16 %v89_v29 }
  0x19   :  { %205 = vmatprep.subr.bf16.mxu0 %v444_v2  ;;  %v142_v38 = vunpack.c.l.bf16 %v131_v30  ;;  %v143_v39 = vunpack.c.h.bf16 %v131_v30  ;;  %v140_v40 = vunpack.c.l.bf16 %v130_v31  ;;  %v141_v23 = vunpack.c.h.bf16 %v130_v31 }
  0x1a   :  { %v164_v41 = vsub.f32 %v114_v19, %v144_v34  ;;  %v165_v42 = vsub.f32 %v115_v20, %v145_v35  ;;  %257 = vmatpush1.bf16.msra.mxu1 %v82_v1  ;;  %v128_v43 = vsub.f32 %v78_v15, %v108_v36  ;;  %v129_v44 = vsub.f32 %v79_v16, %v109_v37 }
  0x1b   :  { %258 = vmatprep.subr.bf16.mxu1 %v444_v2  ;;  %v162_v45 = vsub.f32 %v112_v24, %v142_v38  ;;  %v163_v47 = vsub.f32 %v113_v25, %v143_v39  ;;  %v160_v46 = vsub.f32 %v110_v26, %v140_v40  ;;  %v161_v48 = vsub.f32 %v111_v27, %v141_v23 }
  0x1c   :  { %206 = vmatpush1.bf16.msra.mxu0 %v133_v0  ;;  %v139_v49 = vpack.c.bf16 %v129_v44, %v128_v43  ;;  %v106_v50 = vunpack.c.l.bf16 %v88_v32  ;;  %v107_v51 = vunpack.c.h.bf16 %v88_v32  ;;  %v591_v54 = vpack.c.bf16 %v169_v4, %v550_v3 }
  0x1d   :  { %207 = vmatprep.subr.bf16.mxu0 %v444_v2  ;;  %v593_v55 = vpack.c.bf16 %v167_v18, %v166_v17  ;;  %v595_v56 = vpack.c.bf16 %v165_v42, %v164_v41  ;;  %v599_v59 = vpack.c.bf16 %v163_v47, %v162_v45  ;;  %v604_v4 = vpack.c.bf16 %v161_v48, %v160_v46 }
  0x1e   :  { %259 = vmatpush1.bf16.msra.mxu1 %v552_v5  ;;  %v158_v57 = vunpack.c.l.bf16 %v139_v49  ;;  %v159_v60 = vunpack.c.h.bf16 %v139_v49  ;;  %v126_v61 = vsub.f32 %v76_v21, %v106_v50  ;;  %v127_v58 = vsub.f32 %v77_v22, %v107_v51 }
  0x1f   :  { %260 = vmatprep.subr.bf16.mxu1 %v444_v2  ;;  %v17_v9 = vlaneseq  ;;  %v445_v16 = vmov 0.0   ;;  %vm190_vm3 = vcmask 261120   ;;  %v446_v25 = vmov 1.0|1.0  }
  0x20   :  { %208 = vmatpush1.bf16.msra.mxu0 %v132_v28  ;;  %v178_v62 = vsub.f32 %v128_v43, %v158_v57  ;;  %v179_v63 = vsub.f32 %v129_v44, %v159_v60  ;;  %v138_v0 = vpack.c.bf16 %v127_v58, %v126_v61 }
  0x21   :  { %209 = vmatprep.subr.bf16.mxu0 %v444_v2  ;;  %v18_v10 = vand.u32 127, %v17_v9 }
  0x22   :  { %261 = vmatpush1.bf16.msra.mxu1 %v554_v6  ;;  %v156_v1 = vunpack.c.l.bf16 %v138_v0  ;;  %v157_v3 = vunpack.c.h.bf16 %v138_v0  ;;  %v608_v8 = vpack.c.bf16 %v179_v63, %v178_v62 }
  0x23   :  { %274 = vmatprep.subr.bf16.mxu1 %v444_v2  ;;  %v19_v11 = vadd.s32 128, %v18_v10 }
  0x24   :  { %210 = vmatpush1.bf16.msra.mxu0 %v131_v30  ;;  %v176_v5 = vsub.f32 %v126_v61, %v156_v1  ;;  %v177_v7 = vsub.f32 %v127_v58, %v157_v3 }
  0x25   :  { %211 = vmatprep.subr.bf16.mxu0 %v444_v2 }
  0x26   :  { %275 = vmatpush2.bf16.msra.mxu1 %v89_v29  ;;  %v612_v6 = vpack.c.bf16 %v177_v7, %v176_v5 }
  0x27   :  { %276 = vmatprep.subr.bf16.mxu1 %v444_v2 }
  0x28   :  { %212 = vmatpush1.bf16.msra.mxu0 %v130_v31 }
  0x29   :  { %225 = vmatprep.subr.bf16.mxu0 %v444_v2 }
  0x2a   :  { %277 = vmatpush2.bf16.msra.mxu1 %v88_v32 }
  0x2b   :  { %394 = vmatprep.subr.bf16.mxu1 %v444_v2 }
  0x2c   :  { %226 = vmatpush2.bf16.msra.mxu0 %v139_v49 }
  0x2d   :  { %227 = vmatprep.subr.bf16.mxu0 %v444_v2 }
  0x30   :  { %228 = vmatpush2.bf16.msra.mxu0 %v138_v0 }
  0x31   :  { %295 = vmatprep.subr.bf16.mxu0 %v444_v2 }
  0x7d   :  { %v22_v12 = vpop.permute.xlu0 %21  ;;  %v28_v13 = vpop.permute.xlu1 %27 }
  0x7e   :  { %vm33_vm0 = vcmp.eq.s32.totalorder %v22_v12, %v19_v11  ;;  %vm37_vm1 = vcmp.eq.s32.totalorder %v28_v13, %v19_v11  ;;  %vm32_vm6 = vcmp.eq.s32.totalorder %v22_v12, %v18_v10  ;;  %vm36_vm8 = vcmp.eq.s32.totalorder %v28_v13, %v18_v10 }
  0x7f   :  { %v369_v17 = vsel %vm33_vm0, 1.0, %v445_v16  ;;  %v373_v19 = vsel %vm37_vm1, 1.0, %v445_v16 }
  0x81   :  { %v25_v14 = vpop.permute.xlu0 %24 }
  0x82   :  { %v31_v15 = vpop.permute.xlu1 %30  ;;  %vm35_vm2 = vcmp.eq.s32.totalorder %v25_v14, %v19_v11  ;;  %vm34_vm5 = vcmp.eq.s32.totalorder %v25_v14, %v18_v10 }
  0x83   :  { %vm39_vm4 = vcmp.eq.s32.totalorder %v31_v15, %v19_v11  ;;  %v371_v18 = vsel %vm35_vm2, 1.0, %v445_v16  ;;  %vm616_vm7 = vmpackc.low %vm34_vm5, %vm32_vm6  ;;  %vm38_vm9 = vcmp.eq.s32.totalorder %v31_v15, %v18_v10 }
  0x84   :  { %v375_v20 = vsel %vm39_vm4, 1.0, %v445_v16  ;;  %v57_v21 = vpack.c.bf16 %v371_v18, %v369_v17  ;;  %vm632_vm10 = vmpackc.low %vm38_vm9, %vm36_vm8 }
  0x85   :  { %v59_v24 = vpack.c.bf16 %v375_v20, %v373_v19 }
  0x86   :  { %376 = vmatprep.mubr.msk.bf16.mxu0 %vm190_vm3, %v57_v21  ;;  %382 = vmatprep.mubr.msk.bf16.mxu1 %vm190_vm3, %v57_v21 }
  0x87   :  { %378 = vmatmul.mubr.msk.bf16.vlgmr.msra.gmra.mxu0 %vm616_vm7, %v446_v25  ;;  %384 = vmatmul.mubr.msk.bf16.vlgmr.msra.gmra.mxu1 %vm616_vm7, %v446_v25 }
  0x88   :  { %296 = vmatpush1.bf16.msra.mxu0 %v577_v33  ;;  %404 = vmatpush1.bf16.msra.mxu1 %v577_v33 }
  0x89   :  { %297 = vmatprep.subr.bf16.mxu0 %v444_v2  ;;  %395 = vmatprep.subr.bf16.mxu1 %v444_v2 }
  0x8a   :  { %379 = vmatprep.mubr.msk.bf16.mxu0 %vm190_vm3, %v59_v24  ;;  %385 = vmatprep.mubr.msk.bf16.mxu1 %vm190_vm3, %v59_v24 }
  0x8c   :  { %298 = vmatpush1.bf16.msra.mxu0 %v583_v52  ;;  %405 = vmatpush1.bf16.msra.mxu1 %v583_v52 }
  0x8d   :  { %299 = vmatprep.subr.bf16.mxu0 %v444_v2  ;;  %396 = vmatprep.subr.bf16.mxu1 %v444_v2 }
  0x8f   :  { %381 = vmatmul.mubr.msk.bf16.gmra.mxu0 %vm632_vm10, %v446_v25  ;;  %387 = vmatmul.mubr.msk.bf16.gmra.mxu1 %vm632_vm10, %v446_v25 }
  0x90   :  { %300 = vmatpush1.bf16.msra.mxu0 %v588_v53  ;;  %406 = vmatpush1.bf16.msra.mxu1 %v588_v53 }
  0x91   :  { %388 = vmatprep.mubr.msk.bf16.mxu0 %vm190_vm3, %v57_v21  ;;  %301 = vmatprep.subr.bf16.mxu0 %v444_v2 }
  0x92   :  { %397 = vmatprep.subr.bf16.mxu1 %v444_v2  ;;  %391 = vmatprep.mubr.msk.bf16.mxu1 %vm190_vm3, %v59_v24 }
  0x94   :  { %302 = vmatpush1.bf16.msra.mxu0 %v591_v54  ;;  %407 = vmatpush1.bf16.msra.mxu1 %v591_v54 }
  0x95   :  { %303 = vmatprep.subr.bf16.mxu0 %v444_v2  ;;  %398 = vmatprep.subr.bf16.mxu1 %v444_v2 }
  0x98   :  { %304 = vmatpush1.bf16.msra.mxu0 %v593_v55  ;;  %408 = vmatpush1.bf16.msra.mxu1 %v593_v55 }
  0x99   :  { %305 = vmatprep.subr.bf16.mxu0 %v444_v2  ;;  %399 = vmatprep.subr.bf16.mxu1 %v444_v2 }
  0x9c   :  { %306 = vmatpush1.bf16.msra.mxu0 %v595_v56  ;;  %409 = vmatpush1.bf16.msra.mxu1 %v595_v56 }
  0x9d   :  { %307 = vmatprep.subr.bf16.mxu0 %v444_v2  ;;  %400 = vmatprep.subr.bf16.mxu1 %v444_v2 }
  0xa0   :  { %308 = vmatpush1.bf16.msra.mxu0 %v599_v59  ;;  %410 = vmatpush1.bf16.msra.mxu1 %v599_v59 }
  0xa1   :  { %309 = vmatprep.subr.bf16.mxu0 %v444_v2  ;;  %401 = vmatprep.subr.bf16.mxu1 %v444_v2 }
  0xa4   :  { %310 = vmatpush1.bf16.msra.mxu0 %v604_v4  ;;  %411 = vmatpush1.bf16.msra.mxu1 %v604_v4 }
  0xa5   :  { %323 = vmatprep.subr.bf16.mxu0 %v444_v2  ;;  %402 = vmatprep.subr.bf16.mxu1 %v444_v2 }
  0xa8   :  { %324 = vmatpush2.bf16.msra.mxu0 %v608_v8  ;;  %412 = vmatpush2.bf16.msra.mxu1 %v608_v8 }
  0xa9   :  { %325 = vmatprep.subr.bf16.mxu0 %v444_v2  ;;  %403 = vmatprep.subr.bf16.mxu1 %v444_v2 }
  0xac   :  { %326 = vmatpush2.bf16.msra.mxu0 %v612_v6  ;;  %413 = vmatpush2.bf16.msra.mxu1 %v612_v6 }
  0xaf   :  { %390 = vmatmul.mubr.msk.bf16.vlgmr.msra.gmra.mxu0 %vm616_vm7, %v446_v25  ;;  %393 = vmatmul.mubr.msk.bf16.vlgmr.msra.gmra.mxu1 %vm632_vm10, %v446_v25 }
 0x147   :  { %v231_v27 = vpop.f32.mrf.mxu0  ;;  %v280_v28 = vpop.f32.mrf.mxu1 }
 0x148   :  { %v281_v41 = vadd.f32 %v280_v28, %v231_v27 }
 0x149   :  { %v233_v29 = vpop.f32.mrf.mxu0  ;;  %v282_v30 = vpop.f32.mrf.mxu1 }
 0x14b   :  { %v234_v31 = vpop.f32.mrf.mxu0  ;;  %v283_v32 = vpop.f32.mrf.mxu1 }
 0x14c   :  { %v284_v49 = vadd.f32 %v283_v32, %v234_v31 }
 0x14d   :  { %v236_v33 = vpop.f32.mrf.mxu0  ;;  %v285_v34 = vpop.f32.mrf.mxu1 }
 0x14f   :  { %v239_v35 = vpop.f32.mrf.mxu0  ;;  %v288_v2 = vpop.f32.mrf.mxu1 }
 0x150   :  { %v289_v42 = vadd.f32 %v288_v2, %v239_v35 }
 0x151   :  { %v241_v36 = vpop.f32.mrf.mxu0  ;;  %v290_v37 = vpop.f32.mrf.mxu1 }
 0x153   :  { %v242_v38 = vpop.f32.mrf.mxu0  ;;  %v291_v39 = vpop.f32.mrf.mxu1 }
 0x154   :  { %v292_v50 = vadd.f32 %v291_v39, %v242_v38 }
 0x155   :  { %v244_v40 = vpop.f32.mrf.mxu0  ;;  %v293_v23 = vpop.f32.mrf.mxu1 }
 0x16f   :  { %v329_v43 = vpop.f32.mrf.mxu0  ;;  %v337_v44 = vpop.f32.mrf.mxu1 }
 0x170   :  { %v344_v45 = vadd.f32 %v329_v43, %v281_v41  ;;  %v346_v47 = vadd.f32 %v337_v44, %v289_v42 }
 0x171   :  { %v331_v46 = vpop.f32.mrf.mxu0  ;;  %v339_v48 = vpop.f32.mrf.mxu1 }
 0x172   :  { %348 = vst.msk [vmem:[#allocation2] sm:$0xff] %vm190_vm3, %v344_v45  ;;  %350 = vst.msk [vmem:[#allocation2 + $0x10] sm:$0xff] %vm190_vm3, %v346_v47 }
 0x173   :  { %v332_v51 = vpop.f32.mrf.mxu0  ;;  %v340_v52 = vpop.f32.mrf.mxu1 }
 0x174   :  { %v345_v53 = vadd.f32 %v332_v51, %v284_v49  ;;  %v347_v54 = vadd.f32 %v340_v52, %v292_v50 }
 0x175   :  { %v334_v55 = vpop.f32.mrf.mxu0  ;;  %v342_v56 = vpop.f32.mrf.mxu1 }
 0x176   :  { %349 = vst.msk [vmem:[#allocation2 + $0x8] sm:$0xff] %vm190_vm3, %v345_v53  ;;  %351 = vst.msk [vmem:[#allocation2 + $0x18] sm:$0xff] %vm190_vm3, %v347_v54 }
 0x177   :  { %433 = shalt.err (!%p430_p4)
}
 0x178   :  { %s448_s29 = smov 128   ;;  %s449_s30 = smov 8  }
 0x179   :  { %363 = dma.vmem_to_hbm [thread:$0]  %s358_s27, 512, %s689_s2, [#allocation3], %s448_s29, %s448_s29, %s449_s30  }
 0x17a   :  { %442 = dma.done.wait [#allocation3], 512  }
 0x17b   :  { %443 = vsyncadd [#allocation3], 4294966784 }
 0x17c   :  { %367 = vsyncpa [#allocation3], 1 }

</bundles_post_ra>
